<compile_context>
chip_gen: v6e
topology: v6e:2x2x1
jax: 0.10.0
libtpu: 0.0.40
codegen_flags: <defaults>
</compile_context>

<pallas_src>
import functools

import jax
import jax.numpy as jnp
from jax import lax
from jax.experimental import pallas as pl
from jax.experimental.pallas import tpu as pltpu

LANE = 128
DEFAULT_ROW_TILE = 1024  # (1024, 128) f32 tile = 512 KiB per input buffer


def _round_up(a, b):
    return ((a + b - 1) // b) * b


def _sublane_multiple(dtype):
    size = jnp.dtype(dtype).itemsize
    if size >= 4:
        return 8
    if size == 2:
        return 16
    return 32


def _qfocal_elementwise(x, y, gamma, alpha):
    """QFocal math in f32 with a minimal transcendental count."""
    e = jnp.exp(-jnp.abs(x))                                  # EUP: exp
    bce = jnp.maximum(x, 0.0) - x * y + jnp.log1p(e)          # EUP: log1p
    # numerically stable sigmoid reusing the shared exp
    p = jnp.where(x >= 0.0, jnp.ones_like(e), e) / (1.0 + e)  # EUP: div
    t = jnp.abs(y - p)
    if gamma == 1.5:
        mod = t * jnp.sqrt(t)                                 # EUP: sqrt
    elif gamma == 2.0:
        mod = t * t
    elif gamma == 1.0:
        mod = t
    else:
        mod = t ** gamma                                      # generic fallback
    alpha_factor = y * alpha + (1.0 - y) * (1.0 - alpha)
    return bce * alpha_factor * mod


def _qfocal_partial_kernel(pred_ref, true_ref, out_ref, *, gamma, alpha,
                           n, block_elems, masked):
    x = pred_ref[...].astype(jnp.float32)
    y = true_ref[...].astype(jnp.float32)
    loss = _qfocal_elementwise(x, y, gamma, alpha)
    rt, lanes = loss.shape
    if masked:  # static: only emitted when the flattened array has a padded tail
        i = pl.program_id(0)
        row = lax.broadcasted_iota(jnp.int32, (rt, lanes), 0)
        col = lax.broadcasted_iota(jnp.int32, (rt, lanes), 1)
        lin = i * block_elems + row * lanes + col
        loss = jnp.where(lin < n, loss, 0.0)
    # Fold the (rt, 128) block into an (8, 128) vreg-shaped partial sum using
    # pure VPU adds (layout-preserving reshape, no cross-lane reduce in the
    # steady state).  The tiny final reduce happens in the wrapper.
    folded = jnp.sum(loss.reshape(rt // 8, 8, lanes), axis=0)
    out_ref[0] = folded


def _qfocal_none_kernel(pred_ref, true_ref, out_ref, *, gamma, alpha):
    x = pred_ref[...].astype(jnp.float32)
    y = true_ref[...].astype(jnp.float32)
    out_ref[...] = _qfocal_elementwise(x, y, gamma, alpha).astype(out_ref.dtype)


def _to_slab(a, padded_elems):
    flat = a.reshape(-1)
    if padded_elems != flat.shape[0]:
        flat = jnp.pad(flat, (0, padded_elems - flat.shape[0]))
    return flat.reshape(-1, LANE)


def qfocal_loss(pred, true, *, gamma=1.5, alpha=0.25, reduction="mean",
                row_tile=DEFAULT_ROW_TILE):
    """Pallas implementation of QFocalLoss(nn.BCEWithLogitsLoss(reduction=...))."""
    assert pred.shape == true.shape
    orig_shape = pred.shape
    n = pred.size
    out_dtype = jnp.promote_types(pred.dtype, true.dtype)

    sub = max(_sublane_multiple(pred.dtype), _sublane_multiple(true.dtype),
              _sublane_multiple(out_dtype))
    rows_needed = (n + LANE - 1) // LANE
    if rows_needed <= row_tile:
        rt = _round_up(rows_needed, sub)
    else:
        rt = _round_up(row_tile, sub)
    padded_rows = _round_up(rows_needed, rt)
    num_blocks = padded_rows // rt
    padded_elems = padded_rows * LANE
    masked = padded_elems != n

    # Native-dtype slabs (no host-side f32 upcast; pad only when needed).
    pred2d = _to_slab(pred, padded_elems)
    true2d = _to_slab(true, padded_elems)

    in_spec = pl.BlockSpec((rt, LANE), lambda i: (i, 0))

    if reduction in ("mean", "sum"):
        partials = pl.pallas_call(
            functools.partial(_qfocal_partial_kernel,
                              gamma=float(gamma), alpha=float(alpha),
                              n=n, block_elems=rt * LANE, masked=masked),
            out_shape=jax.ShapeDtypeStruct((num_blocks, 8, LANE), jnp.float32),
            grid_spec=pltpu.PrefetchScalarGridSpec(
                num_scalar_prefetch=0,
                grid=(num_blocks,),
                in_specs=[in_spec, in_spec],
                out_specs=pl.BlockSpec((1, 8, LANE), lambda i: (i, 0, 0)),
            ),
            compiler_params=pltpu.CompilerParams(
                dimension_semantics=("parallel",)),
        )(pred2d, true2d)
        total = jnp.sum(partials)
        return total / n if reduction == "mean" else total

    elif reduction == "none":
        out = pl.pallas_call(
            functools.partial(_qfocal_none_kernel,
                              gamma=float(gamma), alpha=float(alpha)),
            out_shape=jax.ShapeDtypeStruct((padded_rows, LANE), out_dtype),
            grid_spec=pltpu.PrefetchScalarGridSpec(
                num_scalar_prefetch=0,
                grid=(num_blocks,),
                in_specs=[in_spec, in_spec],
                out_specs=pl.BlockSpec((rt, LANE), lambda i: (i, 0)),
            ),
            compiler_params=pltpu.CompilerParams(
                dimension_semantics=("parallel",)),
        )(pred2d, true2d)
        if masked:
            out = out.reshape(-1)[:n]
        return out.reshape(orig_shape)

    else:
        raise ValueError(f"unknown reduction {reduction!r}")


def qfocal_loss_ref(pred, true, gamma=1.5, alpha=0.25, reduction="mean"):
    x = pred.astype(jnp.float32)
    y = true.astype(jnp.float32)
    bce = jnp.maximum(x, 0.0) - x * y + jnp.log1p(jnp.exp(-jnp.abs(x)))
    p = jax.nn.sigmoid(x)
    loss = bce * (y * alpha + (1.0 - y) * (1.0 - alpha)) * jnp.abs(y - p) ** gamma
    if reduction == "mean":
        return loss.mean()
    if reduction == "sum":
        return loss.sum()
    return loss


if __name__ == "__main__":
    key = jax.random.PRNGKey(0)
    k1, k2, k3, k4 = jax.random.split(key, 4)
    # PyTorch-style NCHW logits / soft targets (e.g. objectness / cls maps).
    pred = jax.random.normal(k1, (2, 4, 16, 16), dtype=jnp.float32)
    true = jax.random.uniform(k2, (2, 4, 16, 16), dtype=jnp.float32)

    # Default construction: QFocalLoss(nn.BCEWithLogitsLoss()) -> reduction='mean'
    out_mean = jax.block_until_ready(qfocal_loss(pred, true, reduction="mean"))
    ref_mean = qfocal_loss_ref(pred, true, reduction="mean")
    assert jnp.allclose(out_mean, ref_mean, rtol=1e-5, atol=1e-6), (out_mean, ref_mean)

    out_sum = jax.block_until_ready(qfocal_loss(pred, true, reduction="sum"))
    ref_sum = qfocal_loss_ref(pred, true, reduction="sum")
    assert jnp.allclose(out_sum, ref_sum, rtol=1e-5, atol=1e-4), (out_sum, ref_sum)

    out_none = jax.block_until_ready(qfocal_loss(pred, true, reduction="none"))
    ref_none = qfocal_loss_ref(pred, true, reduction="none")
    assert out_none.shape == pred.shape
    assert jnp.allclose(out_none, ref_none, rtol=1e-5, atol=1e-6)

    # Ragged element count -> exercises the in-kernel tail mask (no mask stream).
    pred_r = jax.random.normal(k3, (3, 5, 7), dtype=jnp.float32)
    true_r = jax.random.uniform(k4, (3, 5, 7), dtype=jnp.float32)
    out_r = jax.block_until_ready(qfocal_loss(pred_r, true_r, reduction="mean"))
    ref_r = qfocal_loss_ref(pred_r, true_r, reduction="mean")
    assert jnp.allclose(out_r, ref_r, rtol=1e-5, atol=1e-6), (out_r, ref_r)

    # bf16 inputs stay bf16 through the DMA (half the HBM read bandwidth).
    pred_b = pred.astype(jnp.bfloat16)
    true_b = true.astype(jnp.bfloat16)
    out_b = jax.block_until_ready(qfocal_loss(pred_b, true_b, reduction="mean"))
    ref_b = qfocal_loss_ref(pred_b, true_b, reduction="mean")
    assert jnp.allclose(out_b, ref_b, rtol=1e-4, atol=1e-5), (out_b, ref_b)

    print("KERNEL_OK")
</pallas_src>

<mosaic_0001>
module attributes {stable_mosaic.version = 11 : i64} {
  func.func @_qfocal_partial_kernel(%arg0: i32, %arg1: memref<16x128xf32, #tpu.memory_space<vmem>>, %arg2: memref<16x128xf32, #tpu.memory_space<vmem>>, %arg3: memref<1x8x128xf32, #tpu.memory_space<vmem>>) attributes {dimension_semantics = [#tpu.dimension_semantics<parallel>], iteration_bounds = array<i64: 1>, scalar_prefetch = 0 : i64, scratch_operands = 0 : i64, tpu.core_type = #tpu.core_type<tc>, window_params = [{transform_indices = @transform_0, window_bounds = array<i64: 16, 128>}, {transform_indices = @transform_1, window_bounds = array<i64: 16, 128>}, {transform_indices = @transform_2, window_bounds = array<i64: 1, 8, 128>}]} {
    %c0 = arith.constant 0 : index
    %c0_0 = arith.constant 0 : index
    %0 = vector.load %arg1[%c0, %c0_0] : memref<16x128xf32, #tpu.memory_space<vmem>>, vector<16x128xf32>
    %c0_1 = arith.constant 0 : index
    %c0_2 = arith.constant 0 : index
    %1 = vector.load %arg2[%c0_1, %c0_2] : memref<16x128xf32, #tpu.memory_space<vmem>>, vector<16x128xf32>
    %2 = math.absf %0 : vector<16x128xf32>
    %cst = arith.constant 0.000000e+00 : f32
    %3 = vector.broadcast %cst : f32 to vector<16x128xf32>
    %4 = arith.subf %3, %2 : vector<16x128xf32>
    %5 = math.exp %4 : vector<16x128xf32>
    %cst_3 = arith.constant 0.000000e+00 : f32
    %6 = vector.broadcast %cst_3 : f32 to vector<16x128xf32>
    %7 = arith.maximumf %0, %6 : vector<16x128xf32>
    %8 = arith.mulf %0, %1 : vector<16x128xf32>
    %9 = arith.subf %7, %8 : vector<16x128xf32>
    %10 = math.log1p %5 : vector<16x128xf32>
    %11 = arith.addf %9, %10 : vector<16x128xf32>
    %cst_4 = arith.constant 0.000000e+00 : f32
    %12 = vector.broadcast %cst_4 : f32 to vector<16x128xf32>
    %13 = arith.cmpf oge, %0, %12 : vector<16x128xf32>
    %cst_5 = arith.constant 1.000000e+00 : f32
    %14 = vector.broadcast %cst_5 : f32 to vector<16x128xf32>
    %15 = arith.select %13, %14, %5 : vector<16x128xi1>, vector<16x128xf32>
    %cst_6 = arith.constant 1.000000e+00 : f32
    %16 = vector.broadcast %cst_6 : f32 to vector<16x128xf32>
    %17 = arith.addf %16, %5 : vector<16x128xf32>
    %18 = arith.divf %15, %17 : vector<16x128xf32>
    %19 = arith.subf %1, %18 : vector<16x128xf32>
    %20 = math.absf %19 : vector<16x128xf32>
    %21 = math.sqrt %20 : vector<16x128xf32>
    %22 = arith.mulf %20, %21 : vector<16x128xf32>
    %cst_7 = arith.constant 2.500000e-01 : f32
    %23 = vector.broadcast %cst_7 : f32 to vector<16x128xf32>
    %24 = arith.mulf %1, %23 : vector<16x128xf32>
    %cst_8 = arith.constant 1.000000e+00 : f32
    %25 = vector.broadcast %cst_8 : f32 to vector<16x128xf32>
    %26 = arith.subf %25, %1 : vector<16x128xf32>
    %cst_9 = arith.constant 7.500000e-01 : f32
    %27 = vector.broadcast %cst_9 : f32 to vector<16x128xf32>
    %28 = arith.mulf %26, %27 : vector<16x128xf32>
    %29 = arith.addf %24, %28 : vector<16x128xf32>
    %30 = arith.mulf %11, %29 : vector<16x128xf32>
    %31 = arith.mulf %30, %22 : vector<16x128xf32>
    %32 = vector.shape_cast %31 : vector<16x128xf32> to vector<2x8x128xf32>
    %cst_10 = arith.constant dense<0.000000e+00> : vector<8x128xf32>
    %33 = vector.multi_reduction <add>, %32, %cst_10 [0] : vector<2x8x128xf32> to vector<8x128xf32>
    %c0_11 = arith.constant 0 : index
    %c0_12 = arith.constant 0 : index
    %c0_13 = arith.constant 0 : index
    %34 = vector.load %arg3[%c0_11, %c0_12, %c0_13] : memref<1x8x128xf32, #tpu.memory_space<vmem>>, vector<1x8x128xf32>
    %35 = vector.shape_cast %34 : vector<1x8x128xf32> to vector<8x128xf32>
    %36 = vector.shape_cast %33 : vector<8x128xf32> to vector<1x8x128xf32>
    tpu.vector_store %arg3[%c0_11, %c0_12, %c0_13], %36 {strides = array<i32>} : memref<1x8x128xf32, #tpu.memory_space<vmem>>, vector<1x8x128xf32>,
    return
  }
  func.func @transform_0(%arg0: i32) -> (i32, i32) {
    %c0_i32 = arith.constant 0 : i32
    %c0_i32_0 = arith.constant 0 : i32
    return %arg0, %c0_i32 : i32, i32
  }
  func.func @transform_1(%arg0: i32) -> (i32, i32) {
    %c0_i32 = arith.constant 0 : i32
    %c0_i32_0 = arith.constant 0 : i32
    return %arg0, %c0_i32 : i32, i32
  }
  func.func @transform_2(%arg0: i32) -> (i32, i32, i32) {
    %c0_i32 = arith.constant 0 : i32
    %c0_i32_0 = arith.constant 0 : i32
    %c0_i32_1 = arith.constant 0 : i32
    return %arg0, %c0_i32, %c0_i32_0 : i32, i32, i32
  }
}

</mosaic_0001>

<bundles_post_ra>
// kernel: tpu_custom_call.1
= control target key start
LH: loop header
LB: loop body
LE: loop exit
PB: predicated region body
PF: predicated region fallthrough
CT: control target
= control target key end

     0   :  { %7 = vsyncpa [#allocation3], 0  ;;  %s254_s0 = inlined_call_operand.hbm [shape: f32[16,128], index: 0, kind: input, shape index: {}]   ;;  %s255_s1 = inlined_call_operand.hbm [shape: f32[16,128], index: 1, kind: input, shape index: {}]   ;;  %s256_s2 = inlined_call_operand.hbm [shape: f32[1,8,128], index: 2, kind: output, shape index: {}]  }
   0x1   :  { %8 = vsyncpa [#allocation6], 0 }
   0x2   :  { %9 = vsyncpa [#allocation4], 0  ;;  %s225_s9 = smov [#allocation2]  }
   0x3   :  { %s15_s10 = sshll.u32 %s225_s9, 4  ;;  %s16_s10 = int_to_ptr.vmem [resolvable:$true] %s15_s10 }
   0x4   :  { %s167_s11 = scalar_lea.vmem %s16_s10, 256  ;;  %p172_p1 = scmp.lt.s32.totalorder %s16_s10, %s16_s10 }
   0x5   :  { %p168_p0 = scmp.ne.s32.totalorder %s16_s10, %s167_s11  ;;  %p173_p2 = scmp.lt.s32.totalorder %s167_s11, %s167_s11 }
   0x7   :  { %p174_p3 = por %p173_p2, %p172_p1 }
   0x9   :  { %p175_p4 = pnand %p174_p3, %p168_p0 }
   0xb   :  { %178 = shalt.err (!%p175_p4)
}
   0xc   :  { %s226_s12 = smov 128   ;;  %s227_s13 = smov 8  }
   0xd   :  { %21 = dma.hbm_to_vmem [thread:$0]  %s254_s0, 256, %s16_s10, [#allocation3], %s226_s12, %s226_s12, %s227_s13  }
   0xe   :  { %s228_s16 = smov [#allocation5]  }
   0xf   :  { %s27_s17 = sshll.u32 %s228_s16, 4  ;;  %s28_s17 = int_to_ptr.vmem [resolvable:$true] %s27_s17 }
  0x10   :  { %s187_s18 = scalar_lea.vmem %s28_s17, 256  ;;  %p192_p6 = scmp.lt.s32.totalorder %s28_s17, %s28_s17 }
  0x11   :  { %p188_p5 = scmp.ne.s32.totalorder %s28_s17, %s187_s18  ;;  %p193_p7 = scmp.lt.s32.totalorder %s187_s18, %s187_s18 }
  0x13   :  { %p194_p8 = por %p193_p7, %p192_p6 }
  0x15   :  { %p195_p9 = pnand %p194_p8, %p188_p5 }
  0x17   :  { %198 = shalt.err (!%p195_p9)
}
  0x18   :  { %33 = dma.hbm_to_vmem [thread:$0]  %s255_s1, 256, %s28_s17, [#allocation6], %s226_s12, %s226_s12, %s227_s13  }
  0x19   :  { %219 = dma.done.wait [#allocation3], 256  }
  0x1a   :  { %220 = vsyncadd [#allocation3], 4294967040 }
  0x1b   :  { %221 = dma.done.wait [#allocation6], 256  }
  0x1c   :  { %222 = vsyncadd [#allocation6], 4294967040  ;;  %v40_v0 = vld [vmem:[#allocation2] sm:$0xff]  ;;  %v41_v1 = vld [vmem:[#allocation2 + $0x8] sm:$0xff]  ;;  %s229_s0 = smov [#allocation7]  }
  0x1d   :  { %v44_v2 = vand.u32 2147483647, %v40_v0  ;;  %v45_v3 = vand.u32 2147483647, %v41_v1  ;;  %vm78_vm0 = vcmp.ge.f32.partialorder %v40_v0, 0.0  ;;  %vm79_vm1 = vcmp.ge.f32.partialorder %v41_v1, 0.0 }
  0x1e   :  { %v42_v15 = vld [vmem:[#allocation5] sm:$0xff]  ;;  %v43_v17 = vld [vmem:[#allocation5 + $0x8] sm:$0xff]  ;;  %v52_v32 = vmax.f32 %v40_v0, 0.0  ;;  %v53_v33 = vmax.f32 %v41_v1, 0.0  ;;  %s128_s1 = sshll.u32 %s229_s0, 4  ;;  %s129_s1 = int_to_ptr.vmem [resolvable:$true] %s128_s1 }
  0x1f   :  { %v46_v4 = vsub.f32 0.0, %v44_v2  ;;  %v47_v5 = vsub.f32 0.0, %v45_v3  ;;  %v54_v34 = vmul.f32 %v42_v15, %v40_v0  ;;  %v110_v35 = vsub.f32 1.0, %v42_v15  ;;  %s199_s21 = scalar_lea.vmem %s129_s1, 128  ;;  %p204_p11 = scmp.lt.s32.totalorder %s129_s1, %s129_s1 }
  0x20   :  { %v55_v36 = vmul.f32 %v43_v17, %v41_v1  ;;  %v111_v39 = vsub.f32 1.0, %v43_v17  ;;  %v108_v43 = vmul.f32 0.25, %v42_v15  ;;  %v109_v47 = vmul.f32 0.25, %v43_v17  ;;  %p200_p10 = scmp.ne.s32.totalorder %s129_s1, %s199_s21  ;;  %p205_p12 = scmp.lt.s32.totalorder %s199_s21, %s199_s21 }
  0x21   :  { %v48_v6 = vmul.f32 1.442695, %v46_v4  ;;  %v50_v7 = vmul.f32 1.442695, %v47_v5  ;;  %v56_v42 = vsub.f32 %v52_v32, %v54_v34  ;;  %v112_v44 = vmul.f32 0.75, %v110_v35 }
  0x22   :  { %v57_v45 = vsub.f32 %v53_v33, %v55_v36  ;;  %v113_v48 = vmul.f32 0.75, %v111_v39  ;;  %p206_p13 = por %p205_p12, %p204_p11 }
  0x23   :  { %143 = vpow2.f32 %v48_v6  ;;  %v114_v51 = vadd.f32 %v112_v44, %v108_v43 }
  0x24   :  { %145 = vpow2.f32 %v50_v7  ;;  %v115_v55 = vadd.f32 %v113_v48, %v109_v47  ;;  %p207_p0 = pnand %p206_p13, %p200_p10 }
  0x30   :  { %v144_v8 = vpop.eup %143 }
  0x31   :  { %v146_v9 = vpop.eup %145  ;;  %v58_v10 = vadd.f32 1.0, %v144_v8  ;;  %v80_v12 = vsel %vm78_vm0, 1.0, %v144_v8  ;;  %v61_v21 = vmul.f32 -0.5, %v144_v8  ;;  %v64_v28 = vand.u32 2147483647, %v144_v8 }
  0x32   :  { %v67_v11 = vadd.f32 1.0, %v146_v9  ;;  %v81_v13 = vsel %vm79_vm1, 1.0, %v146_v9  ;;  %v70_v23 = vmul.f32 -0.5, %v146_v9  ;;  %v73_v31 = vand.u32 2147483647, %v146_v9 }
  0x33   :  { %147 = vrcp.f32 %v58_v10  ;;  %v62_v26 = vadd.f32 1.0, %v61_v21  ;;  %vm65_vm2 = vcmp.lt.f32.partialorder %v64_v28, 0.0004427343 }
  0x34   :  { %149 = vrcp.f32 %v67_v11  ;;  %v71_v29 = vadd.f32 1.0, %v70_v23  ;;  %vm74_vm3 = vcmp.lt.f32.partialorder %v73_v31, 0.0004427343 }
  0x35   :  { %151 = vlog2.f32 %v58_v10  ;;  %v63_v38 = vmul.f32 %v144_v8, %v62_v26 }
  0x36   :  { %153 = vlog2.f32 %v67_v11  ;;  %v72_v41 = vmul.f32 %v146_v9, %v71_v29 }
  0x40   :  { %v148_v14 = vpop.eup %147 }
  0x41   :  { %v150_v16 = vpop.eup %149  ;;  %v85_v18 = vmul.f32 %v148_v14, %v80_v12 }
  0x42   :  { %v87_v19 = vmul.f32 %v150_v16, %v81_v13  ;;  %v152_v27 = vpop.eup %151 }
  0x43   :  { %v88_v20 = vsub.f32 %v42_v15, %v85_v18  ;;  %v154_v30 = vpop.eup %153  ;;  %v60_v37 = vmul.f32 0.6931472, %v152_v27 }
  0x44   :  { %v89_v22 = vsub.f32 %v43_v17, %v87_v19  ;;  %v69_v40 = vmul.f32 0.6931472, %v154_v30 }
  0x45   :  { %v90_v24 = vand.u32 2147483647, %v88_v20  ;;  %v66_v46 = vsel %vm65_vm2, %v63_v38, %v60_v37 }
  0x46   :  { %v91_v25 = vand.u32 2147483647, %v89_v22  ;;  %v75_v49 = vsel %vm74_vm3, %v72_v41, %v69_v40  ;;  %v76_v50 = vadd.f32 %v66_v46, %v56_v42 }
  0x47   :  { %155 = vrsqrt.f32 %v90_v24  ;;  %v77_v53 = vadd.f32 %v75_v49, %v57_v45  ;;  %vm94_vm4 = vcmp.eq.f32.partialorder %v90_v24, inf  ;;  %v97_v54 = vand.u32 2147483648, %v90_v24 }
  0x48   :  { %157 = vrsqrt.f32 %v91_v25  ;;  %vm96_vm5 = vcmp.eq.f32.partialorder %v90_v24, 0.0  ;;  %vm101_vm6 = vcmp.eq.f32.partialorder %v91_v25, inf  ;;  %v104_v58 = vand.u32 2147483648, %v91_v25 }
  0x49   :  { %vm103_vm7 = vcmp.eq.f32.partialorder %v91_v25, 0.0  ;;  %v116_v61 = vmul.f32 %v114_v51, %v76_v50  ;;  %v117_v0 = vmul.f32 %v115_v55, %v77_v53 }
  0x54   :  { %v156_v52 = vpop.eup %155 }
  0x55   :  { %v158_v56 = vpop.eup %157  ;;  %v93_v57 = vmul.f32 %v156_v52, %v90_v24 }
  0x56   :  { %v100_v59 = vmul.f32 %v158_v56, %v91_v25 }
  0x57   :  { %v95_v60 = vsel %vm94_vm4, %v90_v24, %v93_v57 }
  0x58   :  { %v98_v62 = vsel %vm96_vm5, %v97_v54, %v95_v60  ;;  %v102_v63 = vsel %vm101_vm6, %v91_v25, %v100_v59 }
  0x59   :  { %v105_v1 = vsel %vm103_vm7, %v104_v58, %v102_v63  ;;  %v106_v2 = vmul.f32 %v98_v62, %v90_v24 }
  0x5a   :  { %v107_v3 = vmul.f32 %v105_v1, %v91_v25 }
  0x5b   :  { %v118_v4 = vmul.f32 %v116_v61, %v106_v2 }
  0x5c   :  { %v119_v5 = vmul.f32 %v117_v0, %v107_v3 }
  0x5e   :  { %v120_v6 = vadd.f32 %v119_v5, %v118_v4 }
  0x60   :  { %121 = vst [vmem:[#allocation7] sm:$0xff] %v120_v6 }
  0x61   :  { %210 = shalt.err (!%p207_p0)
}
  0x62   :  { %131 = dma.vmem_to_hbm [thread:$0]  %s129_s1, 128, %s256_s2, [#allocation4]  }
  0x63   :  { %223 = dma.done.wait [#allocation4], 128  }
  0x64   :  { %224 = vsyncadd [#allocation4], 4294967168 }
  0x65   :  { %135 = vsyncpa [#allocation3], 1 }
  0x66   :  { %136 = vsyncpa [#allocation6], 1 }
  0x67   :  { %137 = vsyncpa [#allocation4], 1 }

</bundles_post_ra>
